<compile_context>
chip_gen: v5e
topology: v5e:2x2
jax: 0.10.0
libtpu: 0.0.40
codegen_flags: <defaults>
</compile_context>

<pallas_src>
import jax
import jax.numpy as jnp
from jax.experimental import pallas as pl
from jax.experimental.pallas import tpu as pltpu


def _linear_logsoftmax_kernel(x_ref, w_ref, b_ref, o_ref):
    # x_ref: (TM, D) f32     -> cast to the weight dtype on the VPU (no extra
    #                           HBM pass for a standalone convert op).
    # w_ref: (D, V)  bf16    -> resident across the row grid (constant index).
    # b_ref: (1, V)  f32
    # o_ref: (TM, V) out dtype
    x = x_ref[...].astype(w_ref.dtype)
    logits = jnp.dot(x, w_ref[...], preferred_element_type=jnp.float32)
    logits = logits + b_ref[...]                      # broadcast (1, V) -> (TM, V)
    # Numerically stable log-softmax. Strictly row-wise, so stale padded edge
    # rows (when M % tm != 0) cannot contaminate valid rows.
    m = jnp.max(logits, axis=-1, keepdims=True)
    shifted = logits - m
    lse = jnp.log(jnp.sum(jnp.exp(shifted), axis=-1, keepdims=True))
    o_ref[...] = (shifted - lse).astype(o_ref.dtype)


def _vmem_limit_bytes():
    """Generation-aware scoped-VMEM limit: ~3/4 of physical, capped at 112 MiB.

    v5e/v6e (128 MiB physical) -> 96 MiB; v7x (64 MiB per TC) -> 48 MiB.
    Falls back to a conservative 48 MiB if the hardware query is unavailable.
    """
    try:
        phys = int(pltpu.get_tpu_info().vmem_capacity_bytes)
    except Exception:
        phys = 64 << 20
    return int(max(32 << 20, min(phys * 3 // 4, 112 << 20)))


def _pick_tm(M, V, D, *, vmem_limit, out_bytes):
    """Row-tile size under an explicit VMEM budget, with >= 2 grid steps.

    Budget covers: resident bf16 weight + f32 bias (single-buffered),
    double-buffered x and output tiles, and ~2x (tm, V) f32 in-kernel
    temporaries. tm is rounded to MXU / sublane friendly sizes.
    """
    if M <= 8:
        return M
    resident = D * V * 2 + V * 4                        # bf16 weight + f32 bias
    per_row = (2 * D * 4                                # x tile (f32, double-buffered)
               + 2 * V * out_bytes                      # output tile (double-buffered)
               + 2 * V * 4)                             # f32 logits/shifted temporaries
    avail = max(vmem_limit - resident - (4 << 20), 1 << 20)   # 4 MiB headroom
    tm_cap = min(512, max(8, int(avail // per_row)))
    # At least 2 row tiles so both v7x TensorCores get work (harmless on v5e/v6e).
    tm = min(tm_cap, int(pl.cdiv(M, 2)))
    if tm >= M:
        return M
    if tm >= 256:
        tm = (tm // 256) * 256        # v6e/v7x MXU is 2x256x256
    elif tm >= 16:
        tm = (tm // 16) * 16          # bf16 sublane packing
    else:
        tm = max(8, (tm // 8) * 8)    # (8, 128) tiling floor
    return tm


def linear_logsoftmax(x2d, w, b, *, tm=None, out_dtype=jnp.float32):
    """x2d: (M, D) -> (M, V) log-probs.

    `w` should be stored persistently in bf16 by the caller (cast once at
    parameter init, not per call); the matmul accumulates in f32 on the MXU.
    """
    M, D = x2d.shape
    V = w.shape[-1]
    vmem_limit = _vmem_limit_bytes()
    out_bytes = jnp.finfo(out_dtype).bits // 8
    if tm is None:
        tm = _pick_tm(M, V, D, vmem_limit=vmem_limit, out_bytes=out_bytes)

    b2d = b.reshape(1, V).astype(jnp.float32)

    def build(resident_pipeline_mode):
        extra = ({} if resident_pipeline_mode is None
                 else {"pipeline_mode": resident_pipeline_mode})
        return pl.pallas_call(
            _linear_logsoftmax_kernel,
            out_shape=jax.ShapeDtypeStruct((M, V), out_dtype),
            grid_spec=pltpu.PrefetchScalarGridSpec(
                num_scalar_prefetch=0,
                grid=(pl.cdiv(M, tm),),
                in_specs=[
                    pl.BlockSpec((tm, D), lambda i: (i, 0)),          # streamed rows
                    pl.BlockSpec((D, V), lambda i: (0, 0), **extra),  # resident weight
                    pl.BlockSpec((1, V), lambda i: (0, 0), **extra),  # resident bias
                ],
                out_specs=pl.BlockSpec((tm, V), lambda i: (i, 0)),    # lane-dense output
            ),
            compiler_params=pltpu.CompilerParams(
                dimension_semantics=("parallel",),    # row tiles are independent
                vmem_limit_bytes=vmem_limit,
            ),
        )

    try:
        # Single-buffer the resident (constant-index) weight/bias: saves D*V*2
        # bytes of VMEM vs. the default double-buffering.
        return build(pl.Buffered(1))(x2d, w, b2d)
    except Exception:
        # Fallback if this lowering rejects single-buffered pipelined inputs.
        return build(None)(x2d, w, b2d)


def linear_model_forward(x, x_lengths, w, b, *, out_dtype=jnp.float32):
    """Mirrors LinearModel.forward.

    x: (B, T, D) -> returns (log_probs of shape (T, B, V), x_lengths).
    """
    B, T, D = x.shape
    V = w.shape[-1]
    # Transpose the *narrow* (D-wide) input instead of the V-wide output; the
    # kernel then writes rows in (t, b) order, so the (T, B, V) result is a
    # free reshape (no post-kernel HBM pass over the large output).
    x2d = x.transpose(1, 0, 2).reshape(T * B, D)
    y2d = linear_logsoftmax(x2d, w, b, out_dtype=out_dtype)   # (T*B, V)
    return y2d.reshape(T, B, V), x_lengths


if __name__ == "__main__":
    # Small shapes implied by forward: x is (batch, seq, input_dim).
    B, T, D, V = 2, 8, 32, 128

    key = jax.random.PRNGKey(0)
    kx, kw = jax.random.split(key)

    # _init_weights: Linear weight ~ N(0, 0.02), bias = 0.  The weight is stored
    # persistently in bf16 (cast ONCE here, not per forward call), so the kernel
    # reads it from HBM exactly once per call with no standalone convert op.
    w_f32 = (0.02 * jax.random.normal(kw, (D, V))).astype(jnp.float32)  # (in, out)
    w = w_f32.astype(jnp.bfloat16)
    b = jnp.zeros((V,), dtype=jnp.float32)

    x = jax.random.normal(kx, (B, T, D), dtype=jnp.float32)
    x_lengths = jnp.array([T, T - 2], dtype=jnp.int32)

    y, out_lengths = linear_model_forward(x, x_lengths, w, b)
    jax.block_until_ready(y)

    # Reference 1: same bf16-rounded operands, f32 math (tight tolerance, since
    # the MXU bf16 matmul accumulates in f32).
    xb = x.astype(jnp.bfloat16).astype(jnp.float32)
    wb = w.astype(jnp.float32)
    ref_bf16 = jax.nn.log_softmax(xb @ wb + b, axis=-1).transpose(1, 0, 2)
    # Reference 2: full f32 (loose tolerance covers bf16 rounding of x and w).
    ref_f32 = jax.nn.log_softmax(x @ w_f32 + b, axis=-1).transpose(1, 0, 2)

    assert y.shape == (T, B, V)
    assert y.dtype == jnp.float32
    assert jnp.allclose(y, ref_bf16, atol=1e-4, rtol=1e-4)
    assert jnp.allclose(y, ref_f32, atol=2e-2, rtol=2e-2)
    assert jnp.allclose(out_lengths, x_lengths)

    print("KERNEL_OK")
</pallas_src>

<mosaic_0001>
module attributes {stable_mosaic.version = 11 : i64} {
  func.func @_linear_logsoftmax_kernel(%arg0: i32, %arg1: memref<8x32xf32, #tpu.memory_space<vmem>>, %arg2: memref<32x128xbf16, #tpu.memory_space<vmem>>, %arg3: memref<1x128xf32, #tpu.memory_space<vmem>>, %arg4: memref<8x128xf32, #tpu.memory_space<vmem>>) attributes {dimension_semantics = [#tpu.dimension_semantics<parallel>], iteration_bounds = array<i64: 2>, scalar_prefetch = 0 : i64, scratch_operands = 0 : i64, tpu.core_type = #tpu.core_type<tc>, window_params = [{transform_indices = @transform_0, window_bounds = array<i64: 8, 32>}, {pipeline_mode = #tpu.pipeline_mode<synchronous>, transform_indices = @transform_1, window_bounds = array<i64: 32, 128>}, {pipeline_mode = #tpu.pipeline_mode<synchronous>, transform_indices = @transform_2, window_bounds = array<i64: 1, 128>}, {transform_indices = @transform_3, window_bounds = array<i64: 8, 128>}]} {
    %c0 = arith.constant 0 : index
    %c0_0 = arith.constant 0 : index
    %0 = vector.load %arg1[%c0, %c0_0] : memref<8x32xf32, #tpu.memory_space<vmem>>, vector<8x32xf32>
    %1 = arith.truncf %0 : vector<8x32xf32> to vector<8x32xbf16>
    %c0_1 = arith.constant 0 : index
    %c0_2 = arith.constant 0 : index
    %2 = vector.load %arg2[%c0_1, %c0_2] : memref<32x128xbf16, #tpu.memory_space<vmem>>, vector<32x128xbf16>
    %cst = arith.constant dense<0.000000e+00> : vector<8x128xf32>
    %3 = tpu.matmul %1, %2, %cst {dimension_numbers = #tpu.dot_dimension_numbers<[1], [0], [0], [1], [0, 0, 1, 1], [], []>} : vector<8x32xbf16>, vector<32x128xbf16>, vector<8x128xf32> -> vector<8x128xf32>
    %c0_3 = arith.constant 0 : index
    %c0_4 = arith.constant 0 : index
    %4 = vector.load %arg3[%c0_3, %c0_4] : memref<1x128xf32, #tpu.memory_space<vmem>>, vector<1x128xf32>
    %5 = vector.broadcast %4 : vector<1x128xf32> to vector<8x128xf32>
    %6 = arith.addf %3, %5 : vector<8x128xf32>
    %cst_5 = arith.constant dense<0xFF800000> : vector<8xf32>
    %7 = vector.multi_reduction <maximumf>, %6, %cst_5 [1] : vector<8x128xf32> to vector<8xf32>
    %8 = vector.shape_cast %7 : vector<8xf32> to vector<8x1xf32>
    %9 = vector.broadcast %8 : vector<8x1xf32> to vector<8x128xf32>
    %10 = arith.subf %6, %9 : vector<8x128xf32>
    %11 = math.exp %10 : vector<8x128xf32>
    %cst_6 = arith.constant dense<0.000000e+00> : vector<8xf32>
    %12 = vector.multi_reduction <add>, %11, %cst_6 [1] : vector<8x128xf32> to vector<8xf32>
    %13 = vector.shape_cast %12 : vector<8xf32> to vector<8x1xf32>
    %14 = math.log %13 : vector<8x1xf32>
    %15 = vector.broadcast %14 : vector<8x1xf32> to vector<8x128xf32>
    %16 = arith.subf %10, %15 : vector<8x128xf32>
    %c0_7 = arith.constant 0 : index
    %c0_8 = arith.constant 0 : index
    %17 = vector.load %arg4[%c0_7, %c0_8] : memref<8x128xf32, #tpu.memory_space<vmem>>, vector<8x128xf32>
    tpu.vector_store %arg4[%c0_7, %c0_8], %16 {strides = array<i32>} : memref<8x128xf32, #tpu.memory_space<vmem>>, vector<8x128xf32>,
    return
  }
  func.func @transform_0(%arg0: i32) -> (i32, i32) {
    %c0_i32 = arith.constant 0 : i32
    %c0_i32_0 = arith.constant 0 : i32
    return %arg0, %c0_i32 : i32, i32
  }
  func.func @transform_1(%arg0: i32) -> (i32, i32) {
    %c0_i32 = arith.constant 0 : i32
    %c0_i32_0 = arith.constant 0 : i32
    %c0_i32_1 = arith.constant 0 : i32
    return %c0_i32, %c0_i32_0 : i32, i32
  }
  func.func @transform_2(%arg0: i32) -> (i32, i32) {
    %c0_i32 = arith.constant 0 : i32
    %c0_i32_0 = arith.constant 0 : i32
    %c0_i32_1 = arith.constant 0 : i32
    return %c0_i32, %c0_i32_0 : i32, i32
  }
  func.func @transform_3(%arg0: i32) -> (i32, i32) {
    %c0_i32 = arith.constant 0 : i32
    %c0_i32_0 = arith.constant 0 : i32
    return %arg0, %c0_i32 : i32, i32
  }
}

module attributes {stable_mosaic.version = 11 : i64} {
  func.func @_linear_logsoftmax_kernel(%arg0: i32, %arg1: memref<8x32xf32, #tpu.memory_space<vmem>>, %arg2: memref<32x128xbf16, #tpu.memory_space<vmem>>, %arg3: memref<1x128xf32, #tpu.memory_space<vmem>>, %arg4: memref<8x128xf32, #tpu.memory_space<vmem>>) attributes {dimension_semantics = [#tpu.dimension_semantics<parallel>], iteration_bounds = array<i64: 2>, scalar_prefetch = 0 : i64, scratch_operands = 0 : i64, tpu.core_type = #tpu.core_type<tc>, window_params = [{transform_indices = @transform_0, window_bounds = array<i64: 8, 32>}, {pipeline_mode = #tpu.pipeline_mode<synchronous>, transform_indices = @transform_1, window_bounds = array<i64: 32, 128>}, {pipeline_mode = #tpu.pipeline_mode<synchronous>, transform_indices = @transform_2, window_bounds = array<i64: 1, 128>}, {transform_indices = @transform_3, window_bounds = array<i64: 8, 128>}]} {
    %c0 = arith.constant 0 : index
    %c0_0 = arith.constant 0 : index
    %0 = vector.load %arg1[%c0, %c0_0] : memref<8x32xf32, #tpu.memory_space<vmem>>, vector<8x32xf32>
    %1 = arith.truncf %0 : vector<8x32xf32> to vector<8x32xbf16>
    %c0_1 = arith.constant 0 : index
    %c0_2 = arith.constant 0 : index
    %2 = vector.load %arg2[%c0_1, %c0_2] : memref<32x128xbf16, #tpu.memory_space<vmem>>, vector<32x128xbf16>
    %cst = arith.constant dense<0.000000e+00> : vector<8x128xf32>
    %3 = tpu.matmul %1, %2, %cst {dimension_numbers = #tpu.dot_dimension_numbers<[1], [0], [0], [1], [0, 0, 1, 1], [], []>} : vector<8x32xbf16>, vector<32x128xbf16>, vector<8x128xf32> -> vector<8x128xf32>
    %c0_3 = arith.constant 0 : index
    %c0_4 = arith.constant 0 : index
    %4 = vector.load %arg3[%c0_3, %c0_4] : memref<1x128xf32, #tpu.memory_space<vmem>>, vector<1x128xf32>
    %5 = vector.broadcast %4 : vector<1x128xf32> to vector<8x128xf32>
    %6 = arith.addf %3, %5 : vector<8x128xf32>
    %cst_5 = arith.constant dense<0xFF800000> : vector<8xf32>
    %7 = vector.multi_reduction <maximumf>, %6, %cst_5 [1] : vector<8x128xf32> to vector<8xf32>
    %8 = vector.shape_cast %7 : vector<8xf32> to vector<8x1xf32>
    %9 = vector.broadcast %8 : vector<8x1xf32> to vector<8x128xf32>
    %10 = arith.subf %6, %9 : vector<8x128xf32>
    %11 = math.exp %10 : vector<8x128xf32>
    %cst_6 = arith.constant dense<0.000000e+00> : vector<8xf32>
    %12 = vector.multi_reduction <add>, %11, %cst_6 [1] : vector<8x128xf32> to vector<8xf32>
    %13 = vector.shape_cast %12 : vector<8xf32> to vector<8x1xf32>
    %14 = math.log %13 : vector<8x1xf32>
    %15 = vector.broadcast %14 : vector<8x1xf32> to vector<8x128xf32>
    %16 = arith.subf %10, %15 : vector<8x128xf32>
    %c0_7 = arith.constant 0 : index
    %c0_8 = arith.constant 0 : index
    %17 = vector.load %arg4[%c0_7, %c0_8] : memref<8x128xf32, #tpu.memory_space<vmem>>, vector<8x128xf32>
    tpu.vector_store %arg4[%c0_7, %c0_8], %16 {strides = array<i32>} : memref<8x128xf32, #tpu.memory_space<vmem>>, vector<8x128xf32>,
    return
  }
  func.func @transform_0(%arg0: i32) -> (i32, i32) {
    %c0_i32 = arith.constant 0 : i32
    %c0_i32_0 = arith.constant 0 : i32
    return %arg0, %c0_i32 : i32, i32
  }
  func.func @transform_1(%arg0: i32) -> (i32, i32) {
    %c0_i32 = arith.constant 0 : i32
    %c0_i32_0 = arith.constant 0 : i32
    %c0_i32_1 = arith.constant 0 : i32
    return %c0_i32, %c0_i32_0 : i32, i32
  }
  func.func @transform_2(%arg0: i32) -> (i32, i32) {
    %c0_i32 = arith.constant 0 : i32
    %c0_i32_0 = arith.constant 0 : i32
    %c0_i32_1 = arith.constant 0 : i32
    return %c0_i32, %c0_i32_0 : i32, i32
  }
  func.func @transform_3(%arg0: i32) -> (i32, i32) {
    %c0_i32 = arith.constant 0 : i32
    %c0_i32_0 = arith.constant 0 : i32
    return %arg0, %c0_i32 : i32, i32
  }
}

</mosaic_0001>

<bundles_post_ra>
// kernel: tpu_custom_call.1
= control target key start
LH: loop header
LB: loop body
LE: loop exit
PB: predicated region body
PF: predicated region fallthrough
CT: control target
= control target key end

     0   :  { %8 = vsyncpa [#allocation3], 0  ;;  %s739_s0 = inlined_call_operand.hbm [shape: f32[16,32], index: 0, kind: input, shape index: {}]   ;;  %s740_s1 = inlined_call_operand.hbm [shape: bf16[32,128], index: 1, kind: input, shape index: {}]   ;;  %s741_s2 = inlined_call_operand.vmem [shape: f32[1,128], index: 2, kind: input, shape index: {}]   ;;  %s742_s3 = inlined_call_operand.hbm [shape: f32[16,128], index: 3, kind: output, shape index: {}]  }
   0x1   :  { %10 = vsyncpa [#allocation3 + $0x1], 0 }
   0x2   :  { %11 = vsyncpa [#allocation6], 0 }
   0x3   :  { %12 = vsyncpa [#allocation4], 0 }
   0x4   :  { %14 = vsyncpa [#allocation4 + $0x1], 0  ;;  %s596_s12 = smov 0   ;;  %s598_s13 = smov 0  }
   0x5   :  { %s600_s14 = smov 0   ;;  %s602_s15 = smov 0  }
   0x6 LB: > { %s130_s18 = sshll.u32 %s740_s1, 4  ;;  %s620_s19 = sadd.s32 4294967295, %s571_s15   ;;  %s571_s15 = sphi %s602_s15, %s752_s15   ;;  %s567_s14 = sphi %s600_s14, %s751_s14   ;;  %s563_s13 = sphi %s598_s13, %s750_s13   ;;  %s559_s12 = sphi %s596_s12, %s749_s12   ;;  %s131_s18 = int_to_ptr.hbm [resolvable:$true] %s130_s18 }
   0x7   : > { %p353_p0 = scmp.ge.s32.totalorder %s571_s15, 1  ;;  %p41_p1 = scmp.eq.s32.totalorder %s620_s19, 0 }
   0x8   : > { %p119_p2 = scmp.lt.s32.totalorder %s571_s15, 3  ;;  %s573_s21 = smov [#allocation5]  }
   0x9   : > { %s132_s22 = sshll.u32 %s573_s21, 4  ;;  %s574_s23 = smov 64   ;;  %s133_s22 = int_to_ptr.vmem [resolvable:$true] %s132_s22 }
   0xa   : > { %p625_p3 = pnand %p353_p0, %p119_p2  ;;  %s575_s24 = smov 4  }
   0xb   : > { %s352_s25 = sadd.s32 4294967294, %s571_s15   ;;  %s636_s26 = sadd.s32 1, %s571_s15  }
   0xc   : > { %p385_p4 = pneg %p625_p3  ;;  %s27_s27 = sadd.s32 1, %s567_s14 }
   0xd   : > { %s24_s28 = ssub.s32 %s571_s15, %s636_s26  ;;  %p34_p7 = scmp.ne.s32.totalorder %s567_s14, %s563_s13 }
   0xe   : > { %p386_p6 = pnand %p385_p4, %p41_p1  ;;  %p25_p8 = scmp.eq.s32.totalorder %s24_s28, 0 }
   0xf   : > { %p35_p9 = scmp.eq.s32.totalorder %s571_s15, 0  ;;  %p40_p10 = scmp.ne.s32.totalorder %s563_s13, %s559_s12 }
  0x10   : > { %388 = dma.hbm_to_vmem [thread:$0]  (!%p386_p6), %s131_s18, 256, %s133_s22, [#allocation6], %s574_s23, %s574_s23, %s575_s24  }
  0x11   : > { %p106_p11 = scmp.eq.s32.totalorder %s620_s19, 1  ;;  %p652_p12 = por %p41_p1, %p40_p10 }
  0x12   : > { %s648_s29 = scalar_select %p25_p8, %s567_s14, %s27_s27  }
  0x13   : > { %p656_p13 = por %p106_p11, %p34_p7  ;;  %p112_p0 = scmp.eq.s32.totalorder %s352_s25, 1 }
  0x14   : > { %p36_p2 = por %p35_p9, %p34_p7  ;;  %s149_s5 = sand.u32 1, %s567_s14  }
  0x15   : > { %p661_p4 = por %p112_p0, %p40_p10  ;;  %p398_p6 = scmp.lt.s32.totalorder %s571_s15, 2 }
  0x16   : > { %s356_s7 = sshll.u32 %s149_s5, 3  ;;  %s357_s8 = sshll.u32 %s571_s15, 3 }
  0x17   : > { %s157_s11 = scalar_lea.hbm %s739_s0, %s357_s8  ;;  %s153_s17 = scalar_lea.vmem [#allocation2], %s356_s7 }
  0x18   : > { %s159_s16 = sshll.u32 %s157_s11, 4  ;;  %s161_s18 = sshll.u32 %s153_s17, 4  ;;  %s160_s16 = int_to_ptr.hbm [resolvable:$true] %s159_s16  ;;  %s162_s18 = int_to_ptr.vmem [resolvable:$true] %s161_s18 }
  0x19   : > { %p670_p8 = pnand %p398_p6, %p36_p2  ;;  %s150_s22 = scalar_lea.sflag [#allocation3], %s149_s5 }
  0x1a   : > { %s471_s23 = sshra.s32 %s160_s16, 4  ;;  %s478_s28 = scalar_lea.hbm %s739_s0, 16  ;;  %s472_s23 = int_to_ptr.hbm [resolvable:$true] %s471_s23 }
  0x1b   : > { %s473_s24 = scalar_lea.hbm %s472_s23, 8  ;;  %p475_p9 = pneg %p670_p8 }
  0x1c   : > { %p474_p7 = scmp.ne.s32.totalorder %s472_s23, %s473_s24  ;;  %p479_p0 = scmp.lt.s32.totalorder %s472_s23, %s739_s0 }
  0x1d   : > { %p480_p2 = scmp.lt.s32.totalorder %s478_s28, %s473_s24 }
  0x1e   : > { %p476_p10 = pnand %p475_p9, %p474_p7 }
  0x1f   : > { %p481_p6 = por %p480_p2, %p479_p0 }
  0x20   : > { %p477_p11 = pneg %p476_p10 }
  0x22   : > { %p482_p5 = pnand %p481_p6, %p477_p11 }
  0x24   : > { %485 = shalt.err (!%p482_p5)
}
  0x25   : > { %392 = dma.hbm_to_vmem [thread:$0]  (!%p670_p8), %s160_s16, 128, %s162_s18, %s150_s22  }
  0x26   : > { %170 = sbr.rel (%p625_p3) target bundleno = 439 (0x1b7), region = 32  ;;  %s687_s5 = sand.u32 (!%p625_p3), 1, %s563_s13  }
  0x27   : > { %s359_s9 = sshll.u32 (!%p625_p3), %s687_s5, 3  ;;  %s173_s10 = scalar_lea.sflag (!%p625_p3), [#allocation3], %s687_s5 }
  0x28   : > { %s176_s11 = scalar_lea.vmem (!%p625_p3), [#allocation2], %s359_s9 }
  0x2b   : > { %546 = dma.done.wait (%p652_p12), %s173_s10, 128  }
  0x2c   : > { %548 = vsyncadd (%p652_p12), %s173_s10, 4294967168 }
  0x2d   : > { %550 = dma.done.wait (%p41_p1), [#allocation6], 256  }
  0x2e   : > { %552 = vsyncadd (%p41_p1), [#allocation6], 4294967040  ;;  %v376_v0 = vld [vmem:[#allocation5 + $0x8] sm:$0xff]  ;;  %v375_v1 = vld [vmem:[#allocation5] sm:$0xff]  ;;  %vm228_vm0 = vcmask 261120   ;;  %s372_s30 = sshll.u32 %s620_s19, 3 }
  0x2f   : > { %238 = vmatpush.bf16.msra.mxu0 %v376_v0  ;;  %v206_v2 = vld [vmem:[%s176_s11] sm:$0xff]  ;;  %s267_s21 = scalar_lea.hbm %s742_s3, %s372_s30  ;;  %s204_s22 = scalar_lea.vmem [#allocation7], %s359_s9 }
  0x30   : > { %v207_v3 = vpack.c.bf16 %v206_v2, %v206_v2  ;;  %v436_v4 = vld [vmem:[%s741_s2] ss:$0 sm:$0xff]  ;;  %s269_s23 = sshll.u32 %s204_s22, 4  ;;  %s271_s24 = sshll.u32 %s267_s21, 4  ;;  %s270_s23 = int_to_ptr.vmem [resolvable:$true] %s269_s23  ;;  %s272_s24 = int_to_ptr.hbm [resolvable:$true] %s271_s24 }
  0x31   : > { %s257_s25 = scalar_lea.sflag [#allocation4], %s687_s5  ;;  %s515_s27 = sshra.s32 %s272_s24, 4  ;;  %s516_s27 = int_to_ptr.hbm [resolvable:$true] %s515_s27 }
  0x32   : > { %s517_s28 = scalar_lea.hbm %s516_s27, 8  ;;  %s521_s8 = scalar_lea.hbm %s742_s3, 16 }
  0x33   : > { %239 = vmatpush.bf16.msra.mxu0 %v375_v1  ;;  %p518_p1 = scmp.ne.s32.totalorder %s516_s27, %s517_s28  ;;  %p522_p12 = scmp.lt.s32.totalorder %s516_s27, %s742_s3 }
  0x34   : > { %p523_p8 = scmp.lt.s32.totalorder %s521_s8, %s517_s28 }
  0x35   : > { %p519_p3 = pnand %p518_p1, %p656_p13 }
  0x36   : > { %370 = vmatmul.msk.bf16.vlgmr.msra.gmra.mxu0 %vm228_vm0, %v207_v3  ;;  %p524_p7 = por %p523_p8, %p522_p12 }
  0x37   : > { %p520_p5 = pneg %p519_p3 }
  0x39   : > { %p525_p9 = pnand %p524_p7, %p520_p5 }
  0xb3   : > { %v241_v5 = vpop.f32.mrf.mxu0 }
  0xb4   : > { %v242_v6 = vadd.f32 %v436_v4, %v241_v5 }
  0xb6   : > { %245 = vmax.xlane.f32.xlu0 %v242_v6 }
  0xbb   : > { %v243_v7 = vpop.f32.mrf.mxu0 }
 0x129   : > { %v246_v8 = vpop.xlane.xlu0 %245 }
 0x12a   : > { %v247_v9 = vsub.f32 %v242_v6, %v246_v8 }
 0x12c   : > { %v248_v10 = vmul.f32 1.442695, %v247_v9 }
 0x12e   : > { %437 = vpow2.f32 %v248_v10 }
 0x134   : > { %v438_v11 = vpop.eup %437 }
 0x135   : > { %250 = vadd.xlane.f32.xlu0 %v438_v11 }
 0x1a8   : > { %v251_v12 = vpop.xlane.xlu0 %250 }
 0x1a9   : > { %439 = vlog2.f32 %v251_v12 }
 0x1af   : > { %v440_v13 = vpop.eup %439 }
 0x1b0   : > { %v253_v14 = vmul.f32 0.6931472, %v440_v13 }
 0x1b2   : > { %v254_v15 = vsub.f32 %v247_v9, %v253_v14 }
 0x1b4   : > { %255 = vst [vmem:[%s204_s22] sm:$0xff] %v254_v15 }
 0x1b5   : > { %528 = shalt.err (!%p525_p9)
}
 0x1b6   : > { %383 = dma.vmem_to_hbm [thread:$0]  (%p656_p13), %s270_s23, 128, %s272_s24, %s257_s25  }
 0x1b7 PF: > { %s283_s5 = sand.u32 1, %s559_s12   ;;  %p748_p10 = scmp.ge.s32.totalorder %s571_s15, 2 }
 0x1b8   : > { %s284_s11 = scalar_lea.sflag [#allocation4], %s283_s5 }
 0x1b9   : > { %p394_p11 = pnand %p748_p10, %p661_p4 }
 0x1bb   : > { %p395_p0 = pneg %p394_p11 }
 0x1bd   : > { %554 = dma.done.wait (%p395_p0), %s284_s11, 128  }
 0x1be   : > { %556 = vsyncadd (%p395_p0), %s284_s11, 4294967168  ;;  %p17_p2 = scmp.ge.s32.totalorder %s636_s26, 4   ;;  %s749_s12 = smov %s563_s13 }
 0x1bf   : > { %s750_s13 = smov %s567_s14  ;;  %s751_s14 = smov %s648_s29 }
 0x1c0   : > { %s752_s15 = smov %s636_s26  ;;  %19 = sbr.rel (!%p17_p2) target bundleno = 6 (0x6), region = 81 }
 0x1c5   :  { %290 = vsyncpa [#allocation3], 1 }
 0x1c6   :  { %292 = vsyncpa [#allocation3 + $0x1], 1 }
 0x1c7   :  { %293 = vsyncpa [#allocation6], 1 }
 0x1c8   :  { %294 = vsyncpa [#allocation4], 1 }
 0x1c9   :  { %296 = vsyncpa [#allocation4 + $0x1], 1 }

// kernel: tpu_custom_call.1
= control target key start
LH: loop header
LB: loop body
LE: loop exit
PB: predicated region body
PF: predicated region fallthrough
CT: control target
= control target key end

     0   :  { %8 = vsyncpa [#allocation3], 0  ;;  %s739_s0 = inlined_call_operand.hbm [shape: f32[16,32], index: 0, kind: input, shape index: {}]   ;;  %s740_s1 = inlined_call_operand.hbm [shape: bf16[32,128], index: 1, kind: input, shape index: {}]   ;;  %s741_s2 = inlined_call_operand.vmem [shape: f32[1,128], index: 2, kind: input, shape index: {}]   ;;  %s742_s3 = inlined_call_operand.hbm [shape: f32[16,128], index: 3, kind: output, shape index: {}]  }
   0x1   :  { %10 = vsyncpa [#allocation3 + $0x1], 0 }
   0x2   :  { %11 = vsyncpa [#allocation6], 0 }
   0x3   :  { %12 = vsyncpa [#allocation4], 0 }
   0x4   :  { %14 = vsyncpa [#allocation4 + $0x1], 0  ;;  %s596_s12 = smov 0   ;;  %s598_s13 = smov 0  }
   0x5   :  { %s600_s14 = smov 0   ;;  %s602_s15 = smov 0  }
   0x6 LB: > { %s130_s18 = sshll.u32 %s740_s1, 4  ;;  %s620_s19 = sadd.s32 4294967295, %s571_s15   ;;  %s571_s15 = sphi %s602_s15, %s752_s15   ;;  %s567_s14 = sphi %s600_s14, %s751_s14   ;;  %s563_s13 = sphi %s598_s13, %s750_s13   ;;  %s559_s12 = sphi %s596_s12, %s749_s12   ;;  %s131_s18 = int_to_ptr.hbm [resolvable:$true] %s130_s18 }
   0x7   : > { %p353_p0 = scmp.ge.s32.totalorder %s571_s15, 1  ;;  %p41_p1 = scmp.eq.s32.totalorder %s620_s19, 0 }
   0x8   : > { %p119_p2 = scmp.lt.s32.totalorder %s571_s15, 3  ;;  %s573_s21 = smov [#allocation5]  }
   0x9   : > { %s132_s22 = sshll.u32 %s573_s21, 4  ;;  %s574_s23 = smov 64   ;;  %s133_s22 = int_to_ptr.vmem [resolvable:$true] %s132_s22 }
   0xa   : > { %p625_p3 = pnand %p353_p0, %p119_p2  ;;  %s575_s24 = smov 4  }
   0xb   : > { %s352_s25 = sadd.s32 4294967294, %s571_s15   ;;  %s636_s26 = sadd.s32 1, %s571_s15  }
   0xc   : > { %p385_p4 = pneg %p625_p3  ;;  %s27_s27 = sadd.s32 1, %s567_s14 }
   0xd   : > { %s24_s28 = ssub.s32 %s571_s15, %s636_s26  ;;  %p34_p7 = scmp.ne.s32.totalorder %s567_s14, %s563_s13 }
   0xe   : > { %p386_p6 = pnand %p385_p4, %p41_p1  ;;  %p25_p8 = scmp.eq.s32.totalorder %s24_s28, 0 }
   0xf   : > { %p35_p9 = scmp.eq.s32.totalorder %s571_s15, 0  ;;  %p40_p10 = scmp.ne.s32.totalorder %s563_s13, %s559_s12 }
  0x10   : > { %388 = dma.hbm_to_vmem [thread:$0]  (!%p386_p6), %s131_s18, 256, %s133_s22, [#allocation6], %s574_s23, %s574_s23, %s575_s24  }
  0x11   : > { %p106_p11 = scmp.eq.s32.totalorder %s620_s19, 1  ;;  %p652_p12 = por %p41_p1, %p40_p10 }
  0x12   : > { %s648_s29 = scalar_select %p25_p8, %s567_s14, %s27_s27  }
  0x13   : > { %p656_p13 = por %p106_p11, %p34_p7  ;;  %p112_p0 = scmp.eq.s32.totalorder %s352_s25, 1 }
  0x14   : > { %p36_p2 = por %p35_p9, %p34_p7  ;;  %s149_s5 = sand.u32 1, %s567_s14  }
  0x15   : > { %p661_p4 = por %p112_p0, %p40_p10  ;;  %p398_p6 = scmp.lt.s32.totalorder %s571_s15, 2 }
  0x16   : > { %s356_s7 = sshll.u32 %s149_s5, 3  ;;  %s357_s8 = sshll.u32 %s571_s15, 3 }
  0x17   : > { %s157_s11 = scalar_lea.hbm %s739_s0, %s357_s8  ;;  %s153_s17 = scalar_lea.vmem [#allocation2], %s356_s7 }
  0x18   : > { %s159_s16 = sshll.u32 %s157_s11, 4  ;;  %s161_s18 = sshll.u32 %s153_s17, 4  ;;  %s160_s16 = int_to_ptr.hbm [resolvable:$true] %s159_s16  ;;  %s162_s18 = int_to_ptr.vmem [resolvable:$true] %s161_s18 }
  0x19   : > { %p670_p8 = pnand %p398_p6, %p36_p2  ;;  %s150_s22 = scalar_lea.sflag [#allocation3], %s149_s5 }
  0x1a   : > { %s471_s23 = sshra.s32 %s160_s16, 4  ;;  %s478_s28 = scalar_lea.hbm %s739_s0, 16  ;;  %s472_s23 = int_to_ptr.hbm [resolvable:$true] %s471_s23 }
  0x1b   : > { %s473_s24 = scalar_lea.hbm %s472_s23, 8  ;;  %p475_p9 = pneg %p670_p8 }
  0x1c   : > { %p474_p7 = scmp.ne.s32.totalorder %s472_s23, %s473_s24  ;;  %p479_p0 = scmp.lt.s32.totalorder %s472_s23, %s739_s0 }
  0x1d   : > { %p480_p2 = scmp.lt.s32.totalorder %s478_s28, %s473_s24 }
  0x1e   : > { %p476_p10 = pnand %p475_p9, %p474_p7 }
  0x1f   : > { %p481_p6 = por %p480_p2, %p479_p0 }
  0x20   : > { %p477_p11 = pneg %p476_p10 }
  0x22   : > { %p482_p5 = pnand %p481_p6, %p477_p11 }
  0x24   : > { %485 = shalt.err (!%p482_p5)
}
  0x25   : > { %392 = dma.hbm_to_vmem [thread:$0]  (!%p670_p8), %s160_s16, 128, %s162_s18, %s150_s22  }
  0x26   : > { %170 = sbr.rel (%p625_p3) target bundleno = 439 (0x1b7), region = 32  ;;  %s687_s5 = sand.u32 (!%p625_p3), 1, %s563_s13  }
  0x27   : > { %s359_s9 = sshll.u32 (!%p625_p3), %s687_s5, 3  ;;  %s173_s10 = scalar_lea.sflag (!%p625_p3), [#allocation3], %s687_s5 }
  0x28   : > { %s176_s11 = scalar_lea.vmem (!%p625_p3), [#allocation2], %s359_s9 }
  0x2b   : > { %546 = dma.done.wait (%p652_p12), %s173_s10, 128  }
  0x2c   : > { %548 = vsyncadd (%p652_p12), %s173_s10, 4294967168 }
  0x2d   : > { %550 = dma.done.wait (%p41_p1), [#allocation6], 256  }
  0x2e   : > { %552 = vsyncadd (%p41_p1), [#allocation6], 4294967040  ;;  %v376_v0 = vld [vmem:[#allocation5 + $0x8] sm:$0xff]  ;;  %v375_v1 = vld [vmem:[#allocation5] sm:$0xff]  ;;  %vm228_vm0 = vcmask 261120   ;;  %s372_s30 = sshll.u32 %s620_s19, 3 }
  0x2f   : > { %238 = vmatpush.bf16.msra.mxu0 %v376_v0  ;;  %v206_v2 = vld [vmem:[%s176_s11] sm:$0xff]  ;;  %s267_s21 = scalar_lea.hbm %s742_s3, %s372_s30  ;;  %s204_s22 = scalar_lea.vmem [#allocation7], %s359_s9 }
  0x30   : > { %v207_v3 = vpack.c.bf16 %v206_v2, %v206_v2  ;;  %v436_v4 = vld [vmem:[%s741_s2] ss:$0 sm:$0xff]  ;;  %s269_s23 = sshll.u32 %s204_s22, 4  ;;  %s271_s24 = sshll.u32 %s267_s21, 4  ;;  %s270_s23 = int_to_ptr.vmem [resolvable:$true] %s269_s23  ;;  %s272_s24 = int_to_ptr.hbm [resolvable:$true] %s271_s24 }
  0x31   : > { %s257_s25 = scalar_lea.sflag [#allocation4], %s687_s5  ;;  %s515_s27 = sshra.s32 %s272_s24, 4  ;;  %s516_s27 = int_to_ptr.hbm [resolvable:$true] %s515_s27 }
  0x32   : > { %s517_s28 = scalar_lea.hbm %s516_s27, 8  ;;  %s521_s8 = scalar_lea.hbm %s742_s3, 16 }
  0x33   : > { %239 = vmatpush.bf16.msra.mxu0 %v375_v1  ;;  %p518_p1 = scmp.ne.s32.totalorder %s516_s27, %s517_s28  ;;  %p522_p12 = scmp.lt.s32.totalorder %s516_s27, %s742_s3 }
  0x34   : > { %p523_p8 = scmp.lt.s32.totalorder %s521_s8, %s517_s28 }
  0x35   : > { %p519_p3 = pnand %p518_p1, %p656_p13 }
  0x36   : > { %370 = vmatmul.msk.bf16.vlgmr.msra.gmra.mxu0 %vm228_vm0, %v207_v3  ;;  %p524_p7 = por %p523_p8, %p522_p12 }
  0x37   : > { %p520_p5 = pneg %p519_p3 }
  0x39   : > { %p525_p9 = pnand %p524_p7, %p520_p5 }
  0xb3   : > { %v241_v5 = vpop.f32.mrf.mxu0 }
  0xb4   : > { %v242_v6 = vadd.f32 %v436_v4, %v241_v5 }
  0xb6   : > { %245 = vmax.xlane.f32.xlu0 %v242_v6 }
  0xbb   : > { %v243_v7 = vpop.f32.mrf.mxu0 }
 0x129   : > { %v246_v8 = vpop.xlane.xlu0 %245 }
 0x12a   : > { %v247_v9 = vsub.f32 %v242_v6, %v246_v8 }
 0x12c   : > { %v248_v10 = vmul.f32 1.442695, %v247_v9 }
 0x12e   : > { %437 = vpow2.f32 %v248_v10 }
 0x134   : > { %v438_v11 = vpop.eup %437 }
 0x135   : > { %250 = vadd.xlane.f32.xlu0 %v438_v11 }
 0x1a8   : > { %v251_v12 = vpop.xlane.xlu0 %250 }
 0x1a9   : > { %439 = vlog2.f32 %v251_v12 }
 0x1af   : > { %v440_v13 = vpop.eup %439 }
 0x1b0   : > { %v253_v14 = vmul.f32 0.6931472, %v440_v13 }
 0x1b2   : > { %v254_v15 = vsub.f32 %v247_v9, %v253_v14 }
 0x1b4   : > { %255 = vst [vmem:[%s204_s22] sm:$0xff] %v254_v15 }
 0x1b5   : > { %528 = shalt.err (!%p525_p9)
}
 0x1b6   : > { %383 = dma.vmem_to_hbm [thread:$0]  (%p656_p13), %s270_s23, 128, %s272_s24, %s257_s25  }
 0x1b7 PF: > { %s283_s5 = sand.u32 1, %s559_s12   ;;  %p748_p10 = scmp.ge.s32.totalorder %s571_s15, 2 }
 0x1b8   : > { %s284_s11 = scalar_lea.sflag [#allocation4], %s283_s5 }
 0x1b9   : > { %p394_p11 = pnand %p748_p10, %p661_p4 }
 0x1bb   : > { %p395_p0 = pneg %p394_p11 }
 0x1bd   : > { %554 = dma.done.wait (%p395_p0), %s284_s11, 128  }
 0x1be   : > { %556 = vsyncadd (%p395_p0), %s284_s11, 4294967168  ;;  %p17_p2 = scmp.ge.s32.totalorder %s636_s26, 4   ;;  %s749_s12 = smov %s563_s13 }
 0x1bf   : > { %s750_s13 = smov %s567_s14  ;;  %s751_s14 = smov %s648_s29 }
 0x1c0   : > { %s752_s15 = smov %s636_s26  ;;  %19 = sbr.rel (!%p17_p2) target bundleno = 6 (0x6), region = 81 }
 0x1c5   :  { %290 = vsyncpa [#allocation3], 1 }
 0x1c6   :  { %292 = vsyncpa [#allocation3 + $0x1], 1 }
 0x1c7   :  { %293 = vsyncpa [#allocation6], 1 }
 0x1c8   :  { %294 = vsyncpa [#allocation4], 1 }
 0x1c9   :  { %296 = vsyncpa [#allocation4 + $0x1], 1 }

</bundles_post_ra>
